<compile_context>
chip_gen: v7x
topology: tpu7x:2x2x1
jax: 0.10.0
libtpu: 0.0.40
codegen_flags: <defaults>
</compile_context>

<pallas_src>
import numpy as np
import jax
import jax.numpy as jnp
from jax.experimental import pallas as pl
from jax.experimental.pallas import tpu as pltpu

# RGB -> YUV weights, baked in as compile-time scalars (no weight operand).
_WY = (0.2126, 0.7152, 0.0722)
_WU = (-0.09991, -0.33609, 0.436)
_WV = (0.615, -0.55861, -0.05639)

_TARGET_X_BLOCK_BYTES = 2 * 1024 * 1024   # per-step f32 input block target
_MAX_ROW_TILE = 1024                       # cap on H/2 rows per block


def _chroma_kernel(x_ref, sy_ref, suv_ref, o_ref):
    # x_ref : (1, 3, th2, 2W) f32 -- lanes [0,W) = even rows, [W,2W) = odd rows
    # sy_ref: (W, W)   f32 -- [even-col select | odd-col select]
    # suv_ref:(W, W/2) f32 -- 0.25 * (even-col + odd-col select)  (2x2 mean)
    # o_ref : (1, 6, th2, W/2) f32 -- [y00, y01, y10, y11, u, v]
    w = sy_ref.shape[0]
    w2 = suv_ref.shape[1]
    hp = jax.lax.Precision.HIGHEST

    r_t = x_ref[0, 0, :, :w]
    r_b = x_ref[0, 0, :, w:]
    g_t = x_ref[0, 1, :, :w]
    g_b = x_ref[0, 1, :, w:]
    b_t = x_ref[0, 2, :, :w]
    b_b = x_ref[0, 2, :, w:]

    # Luma for even (top) and odd (bottom) rows of each 2x2 block.  (VPU)
    y_t = _WY[0] * r_t + _WY[1] * g_t + _WY[2] * b_t
    y_b = _WY[0] * r_b + _WY[1] * g_b + _WY[2] * b_b

    # Chroma of the row-summed RGB (the colour transform is linear).  (VPU)
    r_s = r_t + r_b
    g_s = g_t + g_b
    b_s = b_t + b_b
    u_s = _WU[0] * r_s + _WU[1] * g_s + _WU[2] * b_s
    v_s = _WV[0] * r_s + _WV[1] * g_s + _WV[2] * b_s

    # Column de-interleave / 2x2 pooling via constant selection matmuls. (MXU)
    sy = sy_ref[...]
    suv = suv_ref[...]
    yt = jnp.dot(y_t, sy, preferred_element_type=jnp.float32, precision=hp)
    yb = jnp.dot(y_b, sy, preferred_element_type=jnp.float32, precision=hp)
    o_ref[0, 0, :, :] = yt[:, :w2]   # y at (even row, even col)
    o_ref[0, 1, :, :] = yt[:, w2:]   # y at (even row, odd  col)
    o_ref[0, 2, :, :] = yb[:, :w2]   # y at (odd  row, even col)
    o_ref[0, 3, :, :] = yb[:, w2:]   # y at (odd  row, odd  col)
    o_ref[0, 4, :, :] = jnp.dot(u_s, suv, preferred_element_type=jnp.float32,
                                precision=hp)
    o_ref[0, 5, :, :] = jnp.dot(v_s, suv, preferred_element_type=jnp.float32,
                                precision=hp)


def chroma_subsample(rgb):
    if rgb.ndim != 4 or rgb.shape[1] != 3:
        raise ValueError("Input must have shape (N, 3, H, W).")
    n, _, h, w = rgb.shape
    if h % 2 or w % 2:
        raise ValueError("H and W must be even.")
    h2, w2 = h // 2, w // 2

    # Free (contiguous) reshape: each even/odd row pair becomes one lane-row.
    x = rgb.astype(jnp.float32).reshape(n, 3, h2, 2 * w)

    # Constant column-selection matrices (compile-time constants).
    # TODO(synk): for very wide images (W >= ~2048) the column axis should be
    # tiled as well; selector VMEM grows as W^2.
    idx = np.arange(w2)
    s_even = np.zeros((w, w2), np.float32)
    s_odd = np.zeros((w, w2), np.float32)
    s_even[2 * idx, idx] = 1.0
    s_odd[2 * idx + 1, idx] = 1.0
    s_y = jnp.asarray(np.concatenate([s_even, s_odd], axis=1))   # (W, W)
    s_uv = jnp.asarray(0.25 * (s_even + s_odd))                  # (W, W/2)

    # Row tile: biggest multiple-of-8 slab of H/2 rows whose input block is
    # around _TARGET_X_BLOCK_BYTES (3 chans * 2W lanes * 4 B per row).
    rows = _TARGET_X_BLOCK_BYTES // (3 * 2 * w * 4)
    th2 = min(h2, _MAX_ROW_TILE, max(8, (rows // 8) * 8))
    grid = (n, pl.cdiv(h2, th2))

    cost = pl.CostEstimate(
        flops=int(n * (3 * h * w * w + 30 * h * w)),
        transcendentals=0,
        bytes_accessed=int(18 * n * h * w + 6 * w * w),
    )

    return pl.pallas_call(
        _chroma_kernel,
        out_shape=jax.ShapeDtypeStruct((n, 6, h2, w2), jnp.float32),
        grid=grid,
        in_specs=[
            pl.BlockSpec((1, 3, th2, 2 * w), lambda b, i: (b, 0, i, 0)),
            pl.BlockSpec((w, 2 * w2), lambda b, i: (0, 0)),
            pl.BlockSpec((w, w2), lambda b, i: (0, 0)),
        ],
        out_specs=pl.BlockSpec((1, 6, th2, w2), lambda b, i: (b, 0, i, 0)),
        compiler_params=pltpu.CompilerParams(
            dimension_semantics=("parallel", "parallel"),
            vmem_limit_bytes=48 * 1024 * 1024,
        ),
        cost_estimate=cost,
    )(x, s_y, s_uv)


def _reference(rgb):
    """Pure-JAX reference matching the PyTorch forward (NCHW)."""
    filt = jnp.asarray([_WY, _WU, _WV], dtype=jnp.float32)
    yuv = jnp.einsum("oc,nchw->nohw", filt, rgb)
    y, u, v = yuv[:, 0:1], yuv[:, 1:2], yuv[:, 2:3]
    n, _, h, w = rgb.shape
    h2, w2 = h // 2, w // 2
    u_p = u.reshape(n, 1, h2, 2, w2, 2).mean(axis=(3, 5))
    v_p = v.reshape(n, 1, h2, 2, w2, 2).mean(axis=(3, 5))
    y_un = y.reshape(n, 1, h2, 2, w2, 2)
    y_un = jnp.transpose(y_un, (0, 1, 3, 5, 2, 4)).reshape(n, 4, h2, w2)
    return jnp.concatenate([y_un, u_p, v_p], axis=1)


if __name__ == "__main__":
    key = jax.random.PRNGKey(0)
    rgb = jax.random.normal(key, (2, 3, 16, 16), dtype=jnp.float32)

    fn = jax.jit(chroma_subsample)
    out = jax.block_until_ready(fn(rgb))
    ref = jax.block_until_ready(_reference(rgb))

    assert out.shape == (2, 6, 8, 8), out.shape
    assert np.allclose(np.asarray(out), np.asarray(ref), atol=1e-5, rtol=1e-5)
    print("KERNEL_OK")
</pallas_src>

<mosaic_0001>
module attributes {stable_mosaic.version = 11 : i64} {
  func.func @_chroma_kernel(%arg0: i32, %arg1: i32, %arg2: memref<1x3x8x32xf32, #tpu.memory_space<vmem>>, %arg3: memref<16x16xf32, #tpu.memory_space<vmem>>, %arg4: memref<16x8xf32, #tpu.memory_space<vmem>>, %arg5: memref<1x6x8x8xf32, #tpu.memory_space<vmem>>) attributes {dimension_semantics = [#tpu.dimension_semantics<parallel>, #tpu.dimension_semantics<parallel>], iteration_bounds = array<i64: 2, 1>, scalar_prefetch = 0 : i64, scratch_operands = 0 : i64, tpu.core_type = #tpu.core_type<tc>, window_params = [{transform_indices = @transform_0, window_bounds = array<i64: 1, 3, 8, 32>}, {pipeline_mode = #tpu.pipeline_mode<synchronous>, transform_indices = @transform_1, window_bounds = array<i64: 16, 16>}, {pipeline_mode = #tpu.pipeline_mode<synchronous>, transform_indices = @transform_2, window_bounds = array<i64: 16, 8>}, {transform_indices = @transform_3, window_bounds = array<i64: 1, 6, 8, 8>}]} {
    %c0 = arith.constant 0 : index
    %c0_0 = arith.constant 0 : index
    %c0_1 = arith.constant 0 : index
    %c0_2 = arith.constant 0 : index
    %0 = vector.load %arg2[%c0, %c0_0, %c0_1, %c0_2] : memref<1x3x8x32xf32, #tpu.memory_space<vmem>>, vector<1x1x8x16xf32>
    %1 = vector.shape_cast %0 : vector<1x1x8x16xf32> to vector<8x16xf32>
    %c0_3 = arith.constant 0 : index
    %c0_4 = arith.constant 0 : index
    %c0_5 = arith.constant 0 : index
    %c16 = arith.constant 16 : index
    %2 = vector.load %arg2[%c0_3, %c0_4, %c0_5, %c16] : memref<1x3x8x32xf32, #tpu.memory_space<vmem>>, vector<1x1x8x16xf32>
    %3 = vector.shape_cast %2 : vector<1x1x8x16xf32> to vector<8x16xf32>
    %c0_6 = arith.constant 0 : index
    %c1 = arith.constant 1 : index
    %c0_7 = arith.constant 0 : index
    %c0_8 = arith.constant 0 : index
    %4 = vector.load %arg2[%c0_6, %c1, %c0_7, %c0_8] : memref<1x3x8x32xf32, #tpu.memory_space<vmem>>, vector<1x1x8x16xf32>
    %5 = vector.shape_cast %4 : vector<1x1x8x16xf32> to vector<8x16xf32>
    %c0_9 = arith.constant 0 : index
    %c1_10 = arith.constant 1 : index
    %c0_11 = arith.constant 0 : index
    %c16_12 = arith.constant 16 : index
    %6 = vector.load %arg2[%c0_9, %c1_10, %c0_11, %c16_12] : memref<1x3x8x32xf32, #tpu.memory_space<vmem>>, vector<1x1x8x16xf32>
    %7 = vector.shape_cast %6 : vector<1x1x8x16xf32> to vector<8x16xf32>
    %c0_13 = arith.constant 0 : index
    %c2 = arith.constant 2 : index
    %c0_14 = arith.constant 0 : index
    %c0_15 = arith.constant 0 : index
    %8 = vector.load %arg2[%c0_13, %c2, %c0_14, %c0_15] : memref<1x3x8x32xf32, #tpu.memory_space<vmem>>, vector<1x1x8x16xf32>
    %9 = vector.shape_cast %8 : vector<1x1x8x16xf32> to vector<8x16xf32>
    %c0_16 = arith.constant 0 : index
    %c2_17 = arith.constant 2 : index
    %c0_18 = arith.constant 0 : index
    %c16_19 = arith.constant 16 : index
    %10 = vector.load %arg2[%c0_16, %c2_17, %c0_18, %c16_19] : memref<1x3x8x32xf32, #tpu.memory_space<vmem>>, vector<1x1x8x16xf32>
    %11 = vector.shape_cast %10 : vector<1x1x8x16xf32> to vector<8x16xf32>
    %cst = arith.constant 2.126000e-01 : f32
    %12 = vector.broadcast %cst : f32 to vector<8x16xf32>
    %13 = arith.mulf %12, %1 : vector<8x16xf32>
    %cst_20 = arith.constant 7.152000e-01 : f32
    %14 = vector.broadcast %cst_20 : f32 to vector<8x16xf32>
    %15 = arith.mulf %14, %5 : vector<8x16xf32>
    %16 = arith.addf %13, %15 : vector<8x16xf32>
    %cst_21 = arith.constant 7.220000e-02 : f32
    %17 = vector.broadcast %cst_21 : f32 to vector<8x16xf32>
    %18 = arith.mulf %17, %9 : vector<8x16xf32>
    %19 = arith.addf %16, %18 : vector<8x16xf32>
    %cst_22 = arith.constant 2.126000e-01 : f32
    %20 = vector.broadcast %cst_22 : f32 to vector<8x16xf32>
    %21 = arith.mulf %20, %3 : vector<8x16xf32>
    %cst_23 = arith.constant 7.152000e-01 : f32
    %22 = vector.broadcast %cst_23 : f32 to vector<8x16xf32>
    %23 = arith.mulf %22, %7 : vector<8x16xf32>
    %24 = arith.addf %21, %23 : vector<8x16xf32>
    %cst_24 = arith.constant 7.220000e-02 : f32
    %25 = vector.broadcast %cst_24 : f32 to vector<8x16xf32>
    %26 = arith.mulf %25, %11 : vector<8x16xf32>
    %27 = arith.addf %24, %26 : vector<8x16xf32>
    %28 = arith.addf %1, %3 : vector<8x16xf32>
    %29 = arith.addf %5, %7 : vector<8x16xf32>
    %30 = arith.addf %9, %11 : vector<8x16xf32>
    %cst_25 = arith.constant -0.0999099984 : f32
    %31 = vector.broadcast %cst_25 : f32 to vector<8x16xf32>
    %32 = arith.mulf %31, %28 : vector<8x16xf32>
    %cst_26 = arith.constant -3.360900e-01 : f32
    %33 = vector.broadcast %cst_26 : f32 to vector<8x16xf32>
    %34 = arith.mulf %33, %29 : vector<8x16xf32>
    %35 = arith.addf %32, %34 : vector<8x16xf32>
    %cst_27 = arith.constant 4.360000e-01 : f32
    %36 = vector.broadcast %cst_27 : f32 to vector<8x16xf32>
    %37 = arith.mulf %36, %30 : vector<8x16xf32>
    %38 = arith.addf %35, %37 : vector<8x16xf32>
    %cst_28 = arith.constant 6.150000e-01 : f32
    %39 = vector.broadcast %cst_28 : f32 to vector<8x16xf32>
    %40 = arith.mulf %39, %28 : vector<8x16xf32>
    %cst_29 = arith.constant -5.586100e-01 : f32
    %41 = vector.broadcast %cst_29 : f32 to vector<8x16xf32>
    %42 = arith.mulf %41, %29 : vector<8x16xf32>
    %43 = arith.addf %40, %42 : vector<8x16xf32>
    %cst_30 = arith.constant -5.639000e-02 : f32
    %44 = vector.broadcast %cst_30 : f32 to vector<8x16xf32>
    %45 = arith.mulf %44, %30 : vector<8x16xf32>
    %46 = arith.addf %43, %45 : vector<8x16xf32>
    %c0_31 = arith.constant 0 : index
    %c0_32 = arith.constant 0 : index
    %47 = vector.load %arg3[%c0_31, %c0_32] : memref<16x16xf32, #tpu.memory_space<vmem>>, vector<16x16xf32>
    %c0_33 = arith.constant 0 : index
    %c0_34 = arith.constant 0 : index
    %48 = vector.load %arg4[%c0_33, %c0_34] : memref<16x8xf32, #tpu.memory_space<vmem>>, vector<16x8xf32>
    %cst_35 = arith.constant dense<0.000000e+00> : vector<8x16xf32>
    %49 = tpu.matmul %19, %47, %cst_35 {dimension_numbers = #tpu.dot_dimension_numbers<[1], [0], [0], [1], [0, 0, 1, 1], [], []>, precision = #tpu.contract_precision<fp32>} : vector<8x16xf32>, vector<16x16xf32>, vector<8x16xf32> -> vector<8x16xf32>
    %cst_36 = arith.constant dense<0.000000e+00> : vector<8x16xf32>
    %50 = tpu.matmul %27, %47, %cst_36 {dimension_numbers = #tpu.dot_dimension_numbers<[1], [0], [0], [1], [0, 0, 1, 1], [], []>, precision = #tpu.contract_precision<fp32>} : vector<8x16xf32>, vector<16x16xf32>, vector<8x16xf32> -> vector<8x16xf32>
    %51 = vector.extract_strided_slice %49 {offsets = [0, 0], sizes = [8, 8], strides = [1, 1]} : vector<8x16xf32> to vector<8x8xf32>
    %c0_37 = arith.constant 0 : index
    %c0_38 = arith.constant 0 : index
    %c0_39 = arith.constant 0 : index
    %c0_40 = arith.constant 0 : index
    %52 = vector.load %arg5[%c0_37, %c0_38, %c0_39, %c0_40] : memref<1x6x8x8xf32, #tpu.memory_space<vmem>>, vector<1x1x8x8xf32>
    %53 = vector.shape_cast %52 : vector<1x1x8x8xf32> to vector<8x8xf32>
    %54 = vector.shape_cast %51 : vector<8x8xf32> to vector<1x1x8x8xf32>
    tpu.vector_store %arg5[%c0_37, %c0_38, %c0_39, %c0_40], %54 {strides = array<i32>} : memref<1x6x8x8xf32, #tpu.memory_space<vmem>>, vector<1x1x8x8xf32>,
    %55 = vector.extract_strided_slice %49 {offsets = [0, 8], sizes = [8, 8], strides = [1, 1]} : vector<8x16xf32> to vector<8x8xf32>
    %c0_41 = arith.constant 0 : index
    %c1_42 = arith.constant 1 : index
    %c0_43 = arith.constant 0 : index
    %c0_44 = arith.constant 0 : index
    %56 = vector.load %arg5[%c0_41, %c1_42, %c0_43, %c0_44] : memref<1x6x8x8xf32, #tpu.memory_space<vmem>>, vector<1x1x8x8xf32>
    %57 = vector.shape_cast %56 : vector<1x1x8x8xf32> to vector<8x8xf32>
    %58 = vector.shape_cast %55 : vector<8x8xf32> to vector<1x1x8x8xf32>
    tpu.vector_store %arg5[%c0_41, %c1_42, %c0_43, %c0_44], %58 {strides = array<i32>} : memref<1x6x8x8xf32, #tpu.memory_space<vmem>>, vector<1x1x8x8xf32>,
    %59 = vector.extract_strided_slice %50 {offsets = [0, 0], sizes = [8, 8], strides = [1, 1]} : vector<8x16xf32> to vector<8x8xf32>
    %c0_45 = arith.constant 0 : index
    %c2_46 = arith.constant 2 : index
    %c0_47 = arith.constant 0 : index
    %c0_48 = arith.constant 0 : index
    %60 = vector.load %arg5[%c0_45, %c2_46, %c0_47, %c0_48] : memref<1x6x8x8xf32, #tpu.memory_space<vmem>>, vector<1x1x8x8xf32>
    %61 = vector.shape_cast %60 : vector<1x1x8x8xf32> to vector<8x8xf32>
    %62 = vector.shape_cast %59 : vector<8x8xf32> to vector<1x1x8x8xf32>
    tpu.vector_store %arg5[%c0_45, %c2_46, %c0_47, %c0_48], %62 {strides = array<i32>} : memref<1x6x8x8xf32, #tpu.memory_space<vmem>>, vector<1x1x8x8xf32>,
    %63 = vector.extract_strided_slice %50 {offsets = [0, 8], sizes = [8, 8], strides = [1, 1]} : vector<8x16xf32> to vector<8x8xf32>
    %c0_49 = arith.constant 0 : index
    %c3 = arith.constant 3 : index
    %c0_50 = arith.constant 0 : index
    %c0_51 = arith.constant 0 : index
    %64 = vector.load %arg5[%c0_49, %c3, %c0_50, %c0_51] : memref<1x6x8x8xf32, #tpu.memory_space<vmem>>, vector<1x1x8x8xf32>
    %65 = vector.shape_cast %64 : vector<1x1x8x8xf32> to vector<8x8xf32>
    %66 = vector.shape_cast %63 : vector<8x8xf32> to vector<1x1x8x8xf32>
    tpu.vector_store %arg5[%c0_49, %c3, %c0_50, %c0_51], %66 {strides = array<i32>} : memref<1x6x8x8xf32, #tpu.memory_space<vmem>>, vector<1x1x8x8xf32>,
    %cst_52 = arith.constant dense<0.000000e+00> : vector<8x8xf32>
    %67 = tpu.matmul %38, %48, %cst_52 {dimension_numbers = #tpu.dot_dimension_numbers<[1], [0], [0], [1], [0, 0, 1, 1], [], []>, precision = #tpu.contract_precision<fp32>} : vector<8x16xf32>, vector<16x8xf32>, vector<8x8xf32> -> vector<8x8xf32>
    %c0_53 = arith.constant 0 : index
    %c4 = arith.constant 4 : index
    %c0_54 = arith.constant 0 : index
    %c0_55 = arith.constant 0 : index
    %68 = vector.load %arg5[%c0_53, %c4, %c0_54, %c0_55] : memref<1x6x8x8xf32, #tpu.memory_space<vmem>>, vector<1x1x8x8xf32>
    %69 = vector.shape_cast %68 : vector<1x1x8x8xf32> to vector<8x8xf32>
    %70 = vector.shape_cast %67 : vector<8x8xf32> to vector<1x1x8x8xf32>
    tpu.vector_store %arg5[%c0_53, %c4, %c0_54, %c0_55], %70 {strides = array<i32>} : memref<1x6x8x8xf32, #tpu.memory_space<vmem>>, vector<1x1x8x8xf32>,
    %cst_56 = arith.constant dense<0.000000e+00> : vector<8x8xf32>
    %71 = tpu.matmul %46, %48, %cst_56 {dimension_numbers = #tpu.dot_dimension_numbers<[1], [0], [0], [1], [0, 0, 1, 1], [], []>, precision = #tpu.contract_precision<fp32>} : vector<8x16xf32>, vector<16x8xf32>, vector<8x8xf32> -> vector<8x8xf32>
    %c0_57 = arith.constant 0 : index
    %c5 = arith.constant 5 : index
    %c0_58 = arith.constant 0 : index
    %c0_59 = arith.constant 0 : index
    %72 = vector.load %arg5[%c0_57, %c5, %c0_58, %c0_59] : memref<1x6x8x8xf32, #tpu.memory_space<vmem>>, vector<1x1x8x8xf32>
    %73 = vector.shape_cast %72 : vector<1x1x8x8xf32> to vector<8x8xf32>
    %74 = vector.shape_cast %71 : vector<8x8xf32> to vector<1x1x8x8xf32>
    tpu.vector_store %arg5[%c0_57, %c5, %c0_58, %c0_59], %74 {strides = array<i32>} : memref<1x6x8x8xf32, #tpu.memory_space<vmem>>, vector<1x1x8x8xf32>,
    return
  }
  func.func @transform_0(%arg0: i32, %arg1: i32) -> (i32, i32, i32, i32) {
    %c0_i32 = arith.constant 0 : i32
    %c0_i32_0 = arith.constant 0 : i32
    %c0_i32_1 = arith.constant 0 : i32
    return %arg0, %c0_i32, %arg1, %c0_i32_0 : i32, i32, i32, i32
  }
  func.func @transform_1(%arg0: i32, %arg1: i32) -> (i32, i32) {
    %c0_i32 = arith.constant 0 : i32
    %c0_i32_0 = arith.constant 0 : i32
    %c0_i32_1 = arith.constant 0 : i32
    return %c0_i32, %c0_i32_0 : i32, i32
  }
  func.func @transform_2(%arg0: i32, %arg1: i32) -> (i32, i32) {
    %c0_i32 = arith.constant 0 : i32
    %c0_i32_0 = arith.constant 0 : i32
    %c0_i32_1 = arith.constant 0 : i32
    return %c0_i32, %c0_i32_0 : i32, i32
  }
  func.func @transform_3(%arg0: i32, %arg1: i32) -> (i32, i32, i32, i32) {
    %c0_i32 = arith.constant 0 : i32
    %c0_i32_0 = arith.constant 0 : i32
    %c0_i32_1 = arith.constant 0 : i32
    return %arg0, %c0_i32, %arg1, %c0_i32_0 : i32, i32, i32, i32
  }
}

</mosaic_0001>

<bundles_post_ra>
// kernel: chroma_subsample.1
= control target key start
LH: loop header
LB: loop body
LE: loop exit
PB: predicated region body
PF: predicated region fallthrough
CT: control target
= control target key end

     0   :  { %8 = vsyncpa [#allocation3], 0  ;;  %s3003_s0 = inlined_call_operand.vmem [shape: f32[2,3,8,32], index: 0, kind: input, shape index: {}]   ;;  %s3004_s1 = inlined_call_operand.vmem [shape: f32[16,16], index: 1, kind: input, shape index: {}]   ;;  %s3005_s2 = inlined_call_operand.vmem [shape: f32[16,8], index: 2, kind: input, shape index: {}]   ;;  %s3006_s3 = inlined_call_operand.hbm [shape: f32[2,6,8,8], index: 3, kind: output, shape index: {}]  }
   0x1   :  { %10 = vsyncpa [#allocation3 + $0x1], 0  ;;  %s2737_s12 = smov 0   ;;  %s2739_s13 = smov 0  }
   0x2   :  { %s2741_s14 = smov 0   ;;  %s2743_s15 = smov 0  }
   0x3   :  { %s2745_s16 = smov 0   ;;  %s2747_s17 = smov 0  }
   0x4 LB: > { %s2196_s18 = sadd.s32 4294967295, %s2707_s17   ;;  %s2197_s19 = sadd.s32 4294967294, %s2707_s17   ;;  %s2707_s17 = sphi %s2747_s17, %s16_s17   ;;  %s2703_s16 = sphi %s2745_s16, %s3013_s16   ;;  %s2699_s15 = sphi %s2743_s15, %s3012_s15   ;;  %s2695_s14 = sphi %s2741_s14, %s3011_s14   ;;  %s2691_s13 = sphi %s2739_s13, %s3010_s13   ;;  %s2687_s12 = sphi %s2737_s12, %s3009_s12  }
   0x5   : > { %s28_s20 = sadd.s32 1, %s2703_s16  ;;  %s107_s21 = sadd.s32 1, %s2695_s14 }
   0x6   : > { %p30_p0 = scmp.ge.s32.totalorder %s28_s20, 2  ;;  %p117_p1 = scmp.ne.s32.totalorder %s2695_s14, %s2691_s13 }
   0x7   : > { %p118_p2 = scmp.eq.s32.totalorder %s2196_s18, 1  ;;  %p123_p3 = scmp.ne.s32.totalorder %s2691_s13, %s2687_s12 }
   0x8   : > { %s3015_s20 = smov (%p30_p0, %s28_s20), 0  ;;  %p124_p5 = scmp.eq.s32.totalorder %s2197_s19, 1 }
   0x9   : > { %p2777_p4 = por %p118_p2, %p117_p1  ;;  %s102_s23 = ssub.s32 %s2703_s16, %s3015_s20 }
   0xa   : > { %p2200_p6 = scmp.ge.s32.totalorder %s2707_s17, 1  ;;  %p105_p7 = scmp.eq.s32.totalorder %s102_s23, 0 }
   0xb   : > { %p2784_p8 = por %p124_p5, %p123_p3  ;;  %p159_p9 = scmp.lt.s32.totalorder %s2707_s17, 3 }
   0xc   : > { %s2790_s25 = scalar_select %p105_p7, %s2695_s14, %s107_s21  }
   0xd   : > { %p160_p10 = pnand %p2200_p6, %p159_p9 }
   0xe   : > { %p186_p11 = scmp.lt.s32.totalorder (!%p160_p10), %s2699_s15, 1  ;;  %v229_v0 = vld [vmem:[%s3004_s1] sm:$0xff] (!%p160_p10)  ;;  %v230_v1 = vld [vmem:[%s3004_s1 + $0x8] sm:$0xff] (!%p160_p10)  ;;  %v2709_v2 = vmov (!%p160_p10), 0.0|0.0   ;;  %vm2710_vm0 = vmmov (!%p160_p10), 0   ;;  %v2711_v5 = vmov (!%p160_p10), 0.0  }
   0xf   : > { %163 = sbr.rel (%p160_p10) target bundleno = 542 (0x21e), region = 32  ;;  %2452 = vmatprep.subr.bf16.mxu0 (!%p160_p10), %v2709_v2  ;;  %v238_v3 = vand.u32 (!%p160_p10), 4294901760, %v229_v0  ;;  %v241_v4 = vand.u32 (!%p160_p10), 4294901760, %v230_v1  ;;  %2470 = vmatprep.subr.bf16.mxu1 (!%p160_p10), %v2709_v2  ;;  %s2712_s8 = smov (!%p160_p10), 112   ;;  %vm233_vm1 = vcmask (!%p160_p10), 130048   ;;  %v231_v32 = vld [vmem:[%s3005_s2] sm:$0xff] (!%p160_p10) }
  0x10   : > { %2288 = vmatprep.mubr.msk.f32.mxu0 (!%p160_p10), %vm2710_vm0, %v2711_v5  ;;  %2330 = vmatprep.mubr.msk.f32.mxu1 (!%p160_p10), %vm2710_vm0, %v2711_v5  ;;  %v232_v33 = vld [vmem:[%s3005_s2 + $0x8] sm:$0xff] (!%p160_p10)  ;;  %v1179_v34 = vand.u32 (!%p160_p10), 4294901760, %v231_v32  ;;  %s183_s19 = sand.u32 (!%p160_p10), 1, %s2691_s13   ;;  %vm1159_vm2 = vcmask (!%p160_p10), 64512   ;;  %s2713_s26 = smov (!%p160_p10), 120  }
  0x11   : > { %v2806_v6 = vpack.c.bf16 (!%p160_p10), %v241_v4, %v238_v3  ;;  %v316_v7 = vsub.f32 (!%p160_p10), %v229_v0, %v238_v3  ;;  %v323_v8 = vsub.f32 (!%p160_p10), %v230_v1, %v241_v4  ;;  %v1182_v35 = vand.u32 (!%p160_p10), 4294901760, %v232_v33  ;;  %s2564_s21 = smul.u32 (!%p160_p10), 48, %s183_s19  ;;  %s2957_s5 = scalar_lea.sflag (!%p160_p10), [#allocation3], %s183_s19 }
  0x12   : > { %v1257_v36 = vsub.f32 (!%p160_p10), %v231_v32, %v1179_v34  ;;  %s2566_s27 = smul.u32 (!%p160_p10), 768, %s2699_s15 }
  0x13   : > { %2454 = vmatpush3.bf16.msra.mxu0 (!%p160_p10), %v2806_v6  ;;  %2472 = vmatpush3.bf16.msra.mxu1 (!%p160_p10), %v2806_v6  ;;  %v317_v16 = vand.u32 (!%p160_p10), 4294901760, %v316_v7  ;;  %v324_v17 = vand.u32 (!%p160_p10), 4294901760, %v323_v8  ;;  %v2831_v30 = vpack.c.bf16 (!%p160_p10), %v323_v8, %v316_v7  ;;  %v1264_v37 = vsub.f32 (!%p160_p10), %v232_v33, %v1182_v35  ;;  %s185_s23 = scalar_lea.vmem (!%p160_p10), [#allocation2], %s2564_s21 }
  0x14   : > { %2455 = vmatprep.subr.bf16.mxu0 (!%p160_p10), %v2709_v2  ;;  %2473 = vmatprep.subr.bf16.mxu1 (!%p160_p10), %v2709_v2  ;;  %v1258_v38 = vand.u32 (!%p160_p10), 4294901760, %v1257_v36  ;;  %v2857_v42 = vpack.c.bf16 (!%p160_p10), %v1182_v35, %v1179_v34  ;;  %s2118_s28 = sshll.u32 (!%p160_p10), %s185_s23, 4  ;;  %s2949_s28 = int_to_ptr.vmem [resolvable:$true] %s2118_s28 }
  0x15   : > { %v318_v20 = vsub.f32 (!%p160_p10), %v316_v7, %v317_v16  ;;  %v325_v21 = vsub.f32 (!%p160_p10), %v323_v8, %v324_v17  ;;  %v2841_v31 = vpack.c.bf16 (!%p160_p10), %v324_v17, %v317_v16  ;;  %v1265_v39 = vand.u32 (!%p160_p10), 4294901760, %v1264_v37  ;;  %s2629_s6 = scalar_lea.vmem (!%p160_p10), %s2949_s28, 768 }
  0x16   : > { %s187_s30 = scalar_select %p186_p11, %s2699_s15, 1  ;;  %v1259_v40 = vsub.f32 %v1257_v36, %v1258_v38  ;;  %v2861_v46 = vpack.c.bf16 %v1264_v37, %v1257_v36 }
  0x17   : > { %v319_v24 = vand.u32 4294901760, %v318_v20  ;;  %v326_v25 = vand.u32 4294901760, %v325_v21  ;;  %v1266_v41 = vsub.f32 %v1264_v37, %v1265_v39  ;;  %v2867_v47 = vpack.c.bf16 %v1265_v39, %v1258_v38  ;;  %p2630_p12 = scmp.ne.s32.totalorder %s2949_s28, %s2629_s6  ;;  %s2714_s15 = smov [#allocation2]  }
  0x18   : > { %s2565_s4 = smul.u32 24, %s187_s30  ;;  %v1260_v43 = vand.u32 4294901760, %v1259_v40 }
  0x19   : > { %v2456_v28 = vpack.c.bf16 %v326_v25, %v319_v24  ;;  %v1267_v44 = vand.u32 4294901760, %v1266_v41  ;;  %p2631_p13 = pnand %p2630_p12, %p2777_p4 }
  0x1a   : > { %s193_s7 = scalar_lea.vmem %s3003_s0, %s2565_s4  ;;  %s2954_s4 = scalar_lea.hbm %s3006_s3, %s2566_s27 }
  0x1b   : > { %v2815_v9 = vld [vmem:[%s193_s7] sm:$0xff]  ;;  %v2817_v10 = vld [vmem:[%s193_s7 + $0x8] sm:$0xff]  ;;  %v2819_v11 = vld [vmem:[%s193_s7 + $0x10] sm:$0xff]  ;;  %v2859_v45 = vpack.c.bf16 %v1267_v44, %v1260_v43  ;;  %p2632_p0 = pneg %p2631_p13  ;;  %s2633_s7 = sshll.u32 %s2714_s15, 4  ;;  %s2634_s7 = int_to_ptr.vmem [resolvable:$false] %s2633_s7 }
  0x1c   : > { %v199_v12 = vmul.f32 0.2126, %v2815_v9  ;;  %v200_v13 = vmul.f32 0.7152, %v2817_v10  ;;  %v202_v14 = vmul.f32 0.0722, %v2819_v11  ;;  %210 = vrot.lane.b32.xlu1 %v2817_v10, %s2712_s8  ;;  %p2636_p1 = scmp.lt.s32.totalorder %s2949_s28, %s2634_s7 }
  0x1e   : > { %v201_v15 = vadd.f32 %v200_v13, %v199_v12 }
  0x20   : > { %v203_v18 = vadd.f32 %v202_v14, %v201_v15  ;;  %215 = vrot.lane.b32.xlu1 %v2819_v11, %s2712_s8 }
  0x22   : > { %696 = vrot.lane.b32.xlu0 %v203_v18, %s2712_s8  ;;  %v235_v19 = vsel %vm233_vm1, %v203_v18, 0 }
  0x23   : > { %v304_v22 = vand.u32 4294901760, %v235_v19 }
  0x25   : > { %v305_v23 = vsub.f32 %v235_v19, %v304_v22 }
  0x26   : > { %205 = vrot.lane.b32.xlu0 %v2815_v9, %s2712_s8  ;;  %s2635_s8 = scalar_lea.vmem %s2634_s7, 1536 }
  0x27   : > { %v306_v26 = vand.u32 4294901760, %v305_v23  ;;  %p2637_p2 = scmp.lt.s32.totalorder %s2635_s8, %s2629_s6 }
  0x29   : > { %v307_v27 = vsub.f32 %v305_v23, %v306_v26  ;;  %p2638_p3 = por %p2637_p2, %p2636_p1 }
  0x2b   : > { %v308_v29 = vand.u32 4294901760, %v307_v27  ;;  %p2639_p5 = pnand %p2638_p3, %p2632_p0 }
  0x2d   : > { %2289 = vmatmul.mubr.f32.vlgmr.msra.gmra.mrb[0].mxu0 %v308_v29 }
  0x2e   : > { %2457 = vmatpush3.bf16.msra.mxu0 %v2456_v28  ;;  %2295 = vmatprep.mubr.msk.f32.mxu0 %vm2710_vm0, %v2711_v5 }
  0x2f   : > { %2458 = vmatprep.subr.bf16.mxu0 %v2709_v2 }
  0x35   : > { %2296 = vmatmul.mubr.f32.vlgmr.msra.gmra.mrb[0].mxu0 %v304_v22 }
  0x36   : > { %2460 = vmatpush3.bf16.msra.mxu0 %v2831_v30  ;;  %2302 = vmatprep.mubr.msk.f32.mxu0 %vm2710_vm0, %v2711_v5 }
  0x37   : > { %2461 = vmatprep.subr.bf16.mxu0 %v2709_v2 }
  0x3d   : > { %2303 = vmatmul.mubr.f32.vlgmr.msra.gmra.mrb[0].mxu0 %v305_v23 }
  0x3e   : > { %2463 = vmatpush3.bf16.msra.mxu0 %v2806_v6  ;;  %2309 = vmatprep.mubr.msk.f32.mxu0 %vm2710_vm0, %v2711_v5 }
  0x3f   : > { %2464 = vmatprep.subr.bf16.mxu0 %v2709_v2 }
  0x45   : > { %2310 = vmatmul.mubr.f32.vlgmr.msra.gmra.mrb[0].mxu0 %v306_v26 }
  0x46   : > { %2466 = vmatpush3.bf16.msra.mxu0 %v2841_v31  ;;  %2316 = vmatprep.mubr.msk.f32.mxu0 %vm2710_vm0, %v2711_v5 }
  0x47   : > { %2467 = vmatprep.subr.bf16.mxu0 %v2709_v2 }
  0x4d   : > { %2317 = vmatmul.mubr.f32.vlgmr.msra.gmra.mrb[0].mxu0 %v304_v22 }
  0x4e   : > { %2469 = vmatpush3.bf16.msra.mxu0 %v2806_v6  ;;  %2323 = vmatprep.mubr.msk.f32.mxu0 %vm2710_vm0, %v2711_v5 }
  0x4f   : > { %2488 = vmatprep.subr.bf16.mxu0 %v2709_v2 }
  0x55   : > { %2324 = vmatmul.mubr.f32.vlgmr.msra.gmra.mrb[0].mxu0 %v304_v22 }
  0x56   : > { %2490 = vmatpush3.bf16.msra.mxu0 %v2857_v42  ;;  %2372 = vmatprep.mubr.msk.f32.mxu0 %vm2710_vm0, %v2711_v5 }
  0x57   : > { %2491 = vmatprep.subr.bf16.mxu0 %v2709_v2 }
  0x8e   : > { %v211_v48 = vpop.permute.xlu1 %210 }
  0x8f   : > { %v213_v52 = vadd.f32 %v2817_v10, %v211_v48 }
  0x91   : > { %v220_v57 = vmul.f32 -0.33609, %v213_v52  ;;  %v225_v10 = vmul.f32 -0.55861, %v213_v52 }
  0x92   : > { %v216_v50 = vpop.permute.xlu1 %215 }
  0x93   : > { %v218_v54 = vadd.f32 %v2819_v11, %v216_v50 }
  0x94   : > { %v697_v49 = vpop.permute.xlu0 %696 }
  0x95   : > { %v698_v51 = vsel %vm233_vm1, %v697_v49, 0  ;;  %v222_v61 = vmul.f32 0.436, %v218_v54  ;;  %v227_v14 = vmul.f32 -0.05639, %v218_v54 }
  0x96   : > { %v2871_v53 = vand.u32 4294901760, %v698_v51 }
  0x98   : > { %v768_v55 = vsub.f32 %v698_v51, %v2871_v53  ;;  %v206_v56 = vpop.permute.xlu0 %205 }
  0x99   : > { %v208_v58 = vadd.f32 %v206_v56, %v2815_v9 }
  0x9a   : > { %v769_v59 = vand.u32 4294901760, %v768_v55 }
  0x9b   : > { %v219_v60 = vmul.f32 -0.09991, %v208_v58  ;;  %v224_v11 = vmul.f32 0.615, %v208_v58 }
  0x9c   : > { %v770_v62 = vsub.f32 %v768_v55, %v769_v59 }
  0x9d   : > { %v221_v63 = vadd.f32 %v220_v57, %v219_v60  ;;  %v226_v13 = vadd.f32 %v225_v10, %v224_v11 }
  0x9e   : > { %v771_v0 = vand.u32 4294901760, %v770_v62 }
  0x9f   : > { %v223_v1 = vadd.f32 %v222_v61, %v221_v63  ;;  %v228_v15 = vadd.f32 %v227_v14, %v226_v13 }
  0xa0   : > { %2331 = vmatmul.mubr.f32.vlgmr.msra.gmra.mrb[0].mxu1 %v771_v0 }
  0xa1   : > { %2475 = vmatpush3.bf16.msra.mxu1 %v2456_v28  ;;  %2337 = vmatprep.mubr.msk.f32.mxu1 %vm2710_vm0, %v2711_v5  ;;  %v1176_v3 = vsel %vm233_vm1, %v223_v1, 0  ;;  %v1640_v16 = vsel %vm233_vm1, %v228_v15, 0 }
  0xa2   : > { %2476 = vmatprep.subr.bf16.mxu1 %v2709_v2  ;;  %v1245_v4 = vand.u32 4294901760, %v1176_v3  ;;  %v1709_v17 = vand.u32 4294901760, %v1640_v16 }
  0xa4   : > { %v1246_v7 = vsub.f32 %v1176_v3, %v1245_v4  ;;  %v1710_v18 = vsub.f32 %v1640_v16, %v1709_v17 }
  0xa6   : > { %v1247_v8 = vand.u32 4294901760, %v1246_v7  ;;  %v1711_v19 = vand.u32 4294901760, %v1710_v18 }
  0xa8   : > { %2338 = vmatmul.mubr.f32.vlgmr.msra.gmra.mrb[0].mxu1 %v2871_v53  ;;  %v1248_v9 = vsub.f32 %v1246_v7, %v1247_v8  ;;  %v1712_v20 = vsub.f32 %v1710_v18, %v1711_v19 }
  0xa9   : > { %2478 = vmatpush3.bf16.msra.mxu1 %v2831_v30  ;;  %2344 = vmatprep.mubr.msk.f32.mxu1 %vm2710_vm0, %v2711_v5 }
  0xaa   : > { %2479 = vmatprep.subr.bf16.mxu1 %v2709_v2  ;;  %v1249_v12 = vand.u32 4294901760, %v1248_v9  ;;  %v1713_v21 = vand.u32 4294901760, %v1712_v20 }
  0xac   : > { %2373 = vmatmul.mubr.f32.vlgmr.msra.gmra.mrb[2].mxu0 %v1249_v12 }
  0xad   : > { %2493 = vmatpush3.bf16.msra.mxu0 %v2859_v45  ;;  %2379 = vmatprep.mubr.msk.f32.mxu0 %vm2710_vm0, %v2711_v5 }
  0xae   : > { %2494 = vmatprep.subr.bf16.mxu0 %v2709_v2 }
  0xb0   : > { %2345 = vmatmul.mubr.f32.vlgmr.msra.gmra.mrb[0].mxu1 %v768_v55 }
  0xb1   : > { %2481 = vmatpush3.bf16.msra.mxu1 %v2806_v6  ;;  %2351 = vmatprep.mubr.msk.f32.mxu1 %vm2710_vm0, %v2711_v5 }
  0xb2   : > { %2482 = vmatprep.subr.bf16.mxu1 %v2709_v2 }
  0xb4   : > { %2380 = vmatmul.mubr.f32.vlgmr.msra.gmra.mrb[2].mxu0 %v1245_v4 }
  0xb5   : > { %2496 = vmatpush3.bf16.msra.mxu0 %v2861_v46  ;;  %2386 = vmatprep.mubr.msk.f32.mxu0 %vm2710_vm0, %v2711_v5 }
  0xb6   : > { %2497 = vmatprep.subr.bf16.mxu0 %v2709_v2 }
  0xb8   : > { %2352 = vmatmul.mubr.f32.vlgmr.msra.gmra.mrb[0].mxu1 %v769_v59 }
  0xb9   : > { %2484 = vmatpush3.bf16.msra.mxu1 %v2841_v31  ;;  %2358 = vmatprep.mubr.msk.f32.mxu1 %vm2710_vm0, %v2711_v5 }
  0xba   : > { %2485 = vmatprep.subr.bf16.mxu1 %v2709_v2 }
  0xbc   : > { %2387 = vmatmul.mubr.f32.vlgmr.msra.gmra.mrb[2].mxu0 %v1246_v7 }
  0xbd   : > { %2499 = vmatpush3.bf16.msra.mxu0 %v2857_v42  ;;  %2393 = vmatprep.mubr.msk.f32.mxu0 %vm2710_vm0, %v2711_v5 }
  0xbe   : > { %2500 = vmatprep.subr.bf16.mxu0 %v2709_v2 }
  0xc0   : > { %2359 = vmatmul.mubr.f32.vlgmr.msra.gmra.mrb[0].mxu1 %v2871_v53 }
  0xc1   : > { %2487 = vmatpush3.bf16.msra.mxu1 %v2806_v6  ;;  %2365 = vmatprep.mubr.msk.f32.mxu1 %vm2710_vm0, %v2711_v5 }
  0xc2   : > { %2506 = vmatprep.subr.bf16.mxu1 %v2709_v2 }
  0xc4   : > { %2394 = vmatmul.mubr.f32.vlgmr.msra.gmra.mrb[2].mxu0 %v1247_v8 }
  0xc5   : > { %2502 = vmatpush3.bf16.msra.mxu0 %v2867_v47  ;;  %2400 = vmatprep.mubr.msk.f32.mxu0 %vm2710_vm0, %v2711_v5 }
  0xc6   : > { %2503 = vmatprep.subr.bf16.mxu0 %v2709_v2 }
  0xc8   : > { %2366 = vmatmul.mubr.f32.vlgmr.msra.gmra.mrb[0].mxu1 %v2871_v53 }
  0xc9   : > { %2508 = vmatpush3.bf16.msra.mxu1 %v2857_v42  ;;  %2414 = vmatprep.mubr.msk.f32.mxu1 %vm2710_vm0, %v2711_v5 }
  0xca   : > { %2509 = vmatprep.subr.bf16.mxu1 %v2709_v2 }
  0xcc   : > { %2415 = vmatmul.mubr.f32.vlgmr.msra.gmra.mrb[2].mxu1 %v1713_v21  ;;  %2401 = vmatmul.mubr.f32.vlgmr.msra.gmra.mrb[2].mxu0 %v1245_v4 }
  0xcd   : > { %2511 = vmatpush3.bf16.msra.mxu1 %v2859_v45  ;;  %2421 = vmatprep.mubr.msk.f32.mxu1 %vm2710_vm0, %v2711_v5 }
  0xce   : > { %2512 = vmatprep.subr.bf16.mxu1 %v2709_v2  ;;  %2505 = vmatpush3.bf16.msra.mxu0 %v2857_v42 }
  0xcf   : > { %2407 = vmatprep.mubr.msk.f32.mxu0 %vm2710_vm0, %v2711_v5 }
  0xd4   : > { %2422 = vmatmul.mubr.f32.vlgmr.msra.gmra.mrb[2].mxu1 %v1709_v17  ;;  %2408 = vmatmul.mubr.f32.vlgmr.msra.gmra.mrb[2].mxu0 %v1245_v4 }
  0xd5   : > { %2514 = vmatpush3.bf16.msra.mxu1 %v2861_v46  ;;  %2428 = vmatprep.mubr.msk.f32.mxu1 %vm2710_vm0, %v2711_v5 }
  0xd6   : > { %2515 = vmatprep.subr.bf16.mxu1 %v2709_v2 }
  0xdc   : > { %2429 = vmatmul.mubr.f32.vlgmr.msra.gmra.mrb[2].mxu1 %v1710_v18 }
  0xdd   : > { %2517 = vmatpush3.bf16.msra.mxu1 %v2857_v42  ;;  %2435 = vmatprep.mubr.msk.f32.mxu1 %vm2710_vm0, %v2711_v5 }
  0xde   : > { %2518 = vmatprep.subr.bf16.mxu1 %v2709_v2 }
  0xe4   : > { %2436 = vmatmul.mubr.f32.vlgmr.msra.gmra.mrb[2].mxu1 %v1711_v19 }
  0xe5   : > { %2520 = vmatpush3.bf16.msra.mxu1 %v2867_v47  ;;  %2442 = vmatprep.mubr.msk.f32.mxu1 %vm2710_vm0, %v2711_v5 }
  0xe6   : > { %2521 = vmatprep.subr.bf16.mxu1 %v2709_v2 }
  0xec   : > { %2443 = vmatmul.mubr.f32.vlgmr.msra.gmra.mrb[2].mxu1 %v1709_v17 }
  0xed   : > { %2523 = vmatpush3.bf16.msra.mxu1 %v2857_v42  ;;  %2449 = vmatprep.mubr.msk.f32.mxu1 %vm2710_vm0, %v2711_v5 }
  0xf4   : > { %2450 = vmatmul.mubr.f32.vlgmr.msra.gmra.mrb[2].mxu1 %v1709_v17 }
 0x128   : > { %v692_v6 = vpop.f32.mrb[0].mxu0 }
 0x129   : > { %1160 = vst.msk [vmem:[%s185_s23] sm:$0xff] %vm1159_vm2, %v692_v6  ;;  %v2325_v22 = vpop.f32.mrb[1].mxu0  ;;  %1162 = vrot.lane.b32.xlu0 %v692_v6, %s2713_s26 }
 0x19b   : > { %v1155_v23 = vpop.f32.mrb[0].mxu1  ;;  %v1163_v2 = vpop.permute.xlu0 %1162 }
 0x19c   : > { %2205 = vst.msk [vmem:[%s185_s23 + $0x10] sm:$0xff] %vm1159_vm2, %v1155_v23  ;;  %1170 = vrot.lane.b32.xlu1 %v1155_v23, %s2713_s26  ;;  %v2367_v24 = vpop.f32.mrb[1].mxu1  ;;  %2204 = vst.msk [vmem:[%s185_s23 + $0x8] sm:$0xff] %vm1159_vm2, %v1163_v2 }
 0x1a7   : > { %v1633_v5 = vpop.f32.mrb[2].mxu0 }
 0x1a8   : > { %2207 = vst.msk [vmem:[%s185_s23 + $0x20] sm:$0xff] %vm1159_vm2, %v1633_v5  ;;  %v2409_v25 = vpop.f32.mrb[3].mxu0 }
 0x1c7   : > { %v2097_v26 = vpop.f32.mrb[2].mxu1 }
 0x1c8   : > { %2208 = vst.msk [vmem:[%s185_s23 + $0x28] sm:$0xff] %vm1159_vm2, %v2097_v26  ;;  %v2451_v27 = vpop.f32.mrb[3].mxu1 }
 0x20e   : > { %v1171_v28 = vpop.permute.xlu1 %1170 }
 0x20f   : > { %2206 = vst.msk [vmem:[%s185_s23 + $0x18] sm:$0xff] %vm1159_vm2, %v1171_v28 }
 0x210   : > { %2642 = shalt.err (!%p2639_p5)
}
 0x211   : > { %s2643_s9 = scalar_lea.hbm %s2954_s4, 768  ;;  %s2647_s18 = scalar_lea.hbm %s3006_s3, 1536 }
 0x212   : > { %p2644_p6 = scmp.ne.s32.totalorder %s2954_s4, %s2643_s9  ;;  %p2648_p10 = scmp.lt.u32.totalorder %s2954_s4, %s3006_s3 }
 0x213   : > { %p2649_p11 = scmp.lt.u32.totalorder %s2647_s18, %s2643_s9  ;;  %p2651_p13 = scmp.lt.u32.totalorder %s2643_s9, %s2954_s4 }
 0x214   : > { %p2645_p7 = pnand %p2644_p6, %p2777_p4 }
 0x215   : > { %p2650_p12 = por %p2649_p11, %p2648_p10 }
 0x216   : > { %p2646_p9 = pneg %p2645_p7 }
 0x217   : > { %p2652_p0 = por %p2651_p13, %p2650_p12 }
 0x219   : > { %p2653_p1 = pnand %p2652_p0, %p2646_p9 }
 0x21b   : > { %2656 = shalt.err (!%p2653_p1)
}
 0x21c   : > { %s2715_s23 = smov 128   ;;  %s2716_s26 = smov 8  }
 0x21d   : > { %2567 = dma.vmem_to_hbm [thread:$0]  (%p2777_p4), %s2949_s28, 768, %s2954_s4, %s2957_s5, %s2715_s23, %s2715_s23, %s2716_s26  }
 0x21e PF: > { %p2573_p2 = scmp.ge.s32.totalorder %s2707_s17, 2  ;;  %s2133_s27 = sand.u32 1, %s2687_s12  }
 0x21f   : > { %s2134_s29 = scalar_lea.sflag [#allocation3], %s2133_s27 }
 0x220   : > { %p2570_p3 = pnand %p2573_p2, %p2784_p8 }
 0x222   : > { %2682 = dma.done.wait (!%p2570_p3), %s2134_s29, 768  }
 0x223   : > { %2684 = vsyncadd (!%p2570_p3), %s2134_s29, 4294966528  ;;  %s16_s17 = sadd.s32 1, %s2707_s17   ;;  %s3009_s12 = smov %s2691_s13 }
 0x224   : > { %p13_p5 = scmp.ge.s32.totalorder %s16_s17, 4   ;;  %s3010_s13 = smov %s2695_s14 }
 0x225   : > { %s3011_s14 = smov %s2790_s25  ;;  %s3012_s15 = smov %s2703_s16 }
 0x226   : > { %s3013_s16 = smov %s3015_s20  ;;  %15 = sbr.rel (!%p13_p5) target bundleno = 4 (0x4), region = 74 }
 0x22d   :  { %2139 = vsyncpa [#allocation3], 1 }
 0x22e   :  { %2141 = vsyncpa [#allocation3 + $0x1], 1 }

</bundles_post_ra>
